<compile_context>
chip_gen: v7x
topology: tpu7x:2x2x1
jax: 0.10.0
libtpu: 0.0.40
codegen_flags: <defaults>
</compile_context>

<pallas_src>
import jax
import jax.numpy as jnp
from jax import lax
from jax.experimental import pallas as pl
from jax.experimental.pallas import tpu as pltpu

HIDDEN = 300          # fixed by the module (nn.Linear(state_dim, 300))
HIDDEN_PAD = 384      # 3 * 128 lanes: zero-padded hidden width
LN_EPS = 1e-5         # torch.nn.LayerNorm default
_INV_H = 1.0 / float(HIDDEN)


def _round_up(x, m):
    return ((x + m - 1) // m) * m


def _critic_kernel(s_ref, w1_ref, b1_ref, r1_ref, r2_ref, c_ref, out_ref):
    """One batch tile: out[0, m] = fc2(LayerNorm(relu(fc1(s[m]))))."""
    # s: (tb, D) f32 | w1: (D, 384) bf16 | b1: (1, 384) f32
    # r1: (384, 128) bf16  col0 = valid-mask, col1 = gamma*w2 (padded rows = 0)
    # r2: (384, 128) bf16  col2 = valid-mask
    # c : (1, 2) f32 SMEM  [beta @ w2 + b2, sum(gamma*w2)]
    # out: (1, tb) f32 lane-dense row (wrapper reshapes to (B, 1))

    # fc1 on the MXU (bf16 operands, f32 accumulation) + bias + ReLU.
    s = s_ref[...].astype(jnp.bfloat16)
    h = jnp.dot(s, w1_ref[...], preferred_element_type=jnp.float32)
    h = jnp.maximum(h + b1_ref[...], 0.0)          # (tb, 384); padded lanes stay 0

    # All three LayerNorm/fc2 reductions via the MXU (f32 accumulation):
    #   col0 = sum(h), col1 = sum(h*gw), col2 = sum(h*h).
    h16 = h.astype(jnp.bfloat16)
    sums = jnp.dot(h16, r1_ref[...], preferred_element_type=jnp.float32)
    sums = sums + jnp.dot(h16 * h16, r2_ref[...], preferred_element_type=jnp.float32)

    # One tile-aligned transpose -> per-row stats become lane-dense rows.
    st = sums.T                                    # (128, tb)
    sum_h = st[0:1, :]
    sum_hgw = st[1:2, :]
    sum_hh = st[2:3, :]

    mean = sum_h * _INV_H
    var = jnp.maximum(sum_hh * _INV_H - mean * mean, 0.0)   # clamp rounding error
    rstd = lax.rsqrt(var + LN_EPS)

    c = c_ref[0, 0]
    sum_gw = c_ref[0, 1]
    out_ref[...] = ((sum_hgw - mean * sum_gw) * rstd + c).astype(out_ref.dtype)


def critic_forward(s, params, *, block_b=512):
    """Critic forward: LayerNorm(ReLU(s @ W1 + b1)) @ W2 + b2 -> (B, 1) f32.

    NOTE: the np.ndarray -> torch.FloatTensor coercion in the torch forward()
    is host-side glue; callers here pass a (B, D) jnp.float32 array directly.
    """
    B, D = s.shape

    # Batch tile: multiple of 128 so the stats transpose and the lane-dense
    # output row stay tile-aligned; batches > 512 rows get >= 2 grid steps so
    # v7x's two TensorCores both receive work (no-op on v5e/v6e).
    tb = _round_up(min(block_b, B), 128)
    if B > 512 and pl.cdiv(B, tb) < 2:
        tb = _round_up(pl.cdiv(B, 2), 128)
    grid_b = pl.cdiv(B, tb)

    # Wrapper-side fold (tiny, once per call): zero-pad 300 -> 384 and build
    # the constant reduction matrices / folded scalars.
    w1p = jnp.pad(params["w1"], ((0, 0), (0, HIDDEN_PAD - HIDDEN))).astype(jnp.bfloat16)
    b1p = jnp.pad(params["b1"], ((0, 0), (0, HIDDEN_PAD - HIDDEN)))
    gw = (params["gamma"] * params["w2"].reshape(1, HIDDEN)).reshape(HIDDEN)   # (300,)
    r1 = jnp.zeros((HIDDEN_PAD, 128), jnp.float32)
    r1 = r1.at[:HIDDEN, 0].set(1.0).at[:HIDDEN, 1].set(gw).astype(jnp.bfloat16)
    r2 = jnp.zeros((HIDDEN_PAD, 128), jnp.float32)
    r2 = r2.at[:HIDDEN, 2].set(1.0).astype(jnp.bfloat16)
    c = (params["beta"] @ params["w2"] + params["b2"]).reshape(())
    sum_gw = jnp.sum(gw)
    consts = jnp.stack([c, sum_gw]).reshape(1, 2).astype(jnp.float32)

    out = pl.pallas_call(
        _critic_kernel,
        out_shape=jax.ShapeDtypeStruct((grid_b, 1, tb), jnp.float32),
        grid=(grid_b,),
        in_specs=[
            # batch tile: pipelined / double-buffered across the grid
            pl.BlockSpec((tb, D), lambda i: (i, 0)),
            # weights / reduction matrices: constant block index -> VMEM-resident
            pl.BlockSpec((D, HIDDEN_PAD), lambda i: (0, 0)),
            pl.BlockSpec((1, HIDDEN_PAD), lambda i: (0, 0)),
            pl.BlockSpec((HIDDEN_PAD, 128), lambda i: (0, 0)),
            pl.BlockSpec((HIDDEN_PAD, 128), lambda i: (0, 0)),
            # folded scalars in SMEM (cheap sreg reads)
            pl.BlockSpec(memory_space=pltpu.MemorySpace.SMEM),
        ],
        # lane-dense output row per grid step; leading grid dim squeezed
        out_specs=pl.BlockSpec((None, 1, tb), lambda i: (i, 0, 0)),
        compiler_params=pltpu.CompilerParams(
            dimension_semantics=("parallel",),
            vmem_limit_bytes=32 * 1024 * 1024,
        ),
    )(s, w1p, b1p, r1, r2, consts)

    # (grid_b, 1, tb) -> (B, 1); padded tail rows (if any) are sliced away.
    return out.reshape(grid_b * tb, 1)[:B]


def init_critic_params(state_dim, key):
    """Deterministic init mirroring torch defaults (uniform +/- 1/sqrt(fan_in))."""
    k1, k2, k3, k4 = jax.random.split(key, 4)
    bound1 = 1.0 / jnp.sqrt(jnp.float32(state_dim))
    bound2 = 1.0 / jnp.sqrt(jnp.float32(HIDDEN))
    # Stored transposed to (in, out) for the kernel's x @ W convention.
    w1 = jax.random.uniform(k1, (state_dim, HIDDEN), jnp.float32, -bound1, bound1)
    b1 = jax.random.uniform(k2, (1, HIDDEN), jnp.float32, -bound1, bound1)
    w2 = jax.random.uniform(k3, (HIDDEN, 1), jnp.float32, -bound2, bound2)
    b2 = jax.random.uniform(k4, (1, 1), jnp.float32, -bound2, bound2)
    gamma = jnp.ones((1, HIDDEN), jnp.float32)   # LayerNorm weight init
    beta = jnp.zeros((1, HIDDEN), jnp.float32)   # LayerNorm bias init
    return {"w1": w1, "b1": b1, "gamma": gamma, "beta": beta, "w2": w2, "b2": b2}


def critic_reference(s, p, *, matmul_dtype=jnp.float32):
    """Pure-JAX reference. matmul_dtype=bf16 mirrors the kernel's fc1 precision."""
    h = jnp.dot(s.astype(matmul_dtype), p["w1"].astype(matmul_dtype),
                preferred_element_type=jnp.float32)
    h = jnp.maximum(h + p["b1"], 0.0)
    mean = jnp.mean(h, axis=-1, keepdims=True)
    var = jnp.mean((h - mean) ** 2, axis=-1, keepdims=True)
    xn = (h - mean) / jnp.sqrt(var + LN_EPS) * p["gamma"] + p["beta"]
    return xn @ p["w2"] + p["b2"]


if __name__ == "__main__":
    key = jax.random.PRNGKey(0)
    k_param, k_s1, k_s2 = jax.random.split(key, 3)

    state_dim = 32
    params = init_critic_params(state_dim, k_param)

    # Small shape matching the module interface (single grid step, ragged tile).
    s_small = jax.random.normal(k_s1, (2, state_dim), dtype=jnp.float32)
    out_small = jax.block_until_ready(critic_forward(s_small, params))

    # Multi-tile grid path with a ragged last tile (exercises resident weights
    # across grid steps and the lane-dense per-tile output rows).
    s_multi = jax.random.normal(k_s2, (400, state_dim), dtype=jnp.float32)
    out_multi = jax.block_until_ready(critic_forward(s_multi, params, block_b=128))

    for s_in, out in ((s_small, out_small), (s_multi, out_multi)):
        assert out.shape == (s_in.shape[0], 1)
        # Check against a reference sharing the kernel's bf16 fc1 precision
        # (the kernel additionally runs its LN reductions on bf16-rounded h,
        #  hence the 5e-3 budget).
        ref_bf16 = critic_reference(s_in, params, matmul_dtype=jnp.bfloat16)
        assert jnp.allclose(out, ref_bf16, atol=5e-3, rtol=5e-3), (out, ref_bf16)
        # Loose sanity check against the full-f32 reference (bf16 fc1 error).
        ref_f32 = critic_reference(s_in, params)
        assert jnp.allclose(out, ref_f32, atol=1e-1, rtol=1e-1), (out, ref_f32)

    print("KERNEL_OK")
</pallas_src>

<mosaic_0001>
module attributes {stable_mosaic.version = 11 : i64} {
  func.func @_critic_kernel(%arg0: i32, %arg1: memref<128x32xf32, #tpu.memory_space<vmem>>, %arg2: memref<32x384xbf16, #tpu.memory_space<vmem>>, %arg3: memref<1x384xf32, #tpu.memory_space<vmem>>, %arg4: memref<384x128xbf16, #tpu.memory_space<vmem>>, %arg5: memref<384x128xbf16, #tpu.memory_space<vmem>>, %arg6: memref<1x2xf32, #tpu.memory_space<smem>>, %arg7: memref<1x1x128xf32, #tpu.memory_space<vmem>>) attributes {dimension_semantics = [#tpu.dimension_semantics<parallel>], iteration_bounds = array<i64: 1>, scalar_prefetch = 0 : i64, scratch_operands = 0 : i64, tpu.core_type = #tpu.core_type<tc>, window_params = [{transform_indices = @transform_0, window_bounds = array<i64: 128, 32>}, {pipeline_mode = #tpu.pipeline_mode<synchronous>, transform_indices = @transform_1, window_bounds = array<i64: 32, 384>}, {pipeline_mode = #tpu.pipeline_mode<synchronous>, transform_indices = @transform_2, window_bounds = array<i64: 1, 384>}, {pipeline_mode = #tpu.pipeline_mode<synchronous>, transform_indices = @transform_3, window_bounds = array<i64: 384, 128>}, {pipeline_mode = #tpu.pipeline_mode<synchronous>, transform_indices = @transform_4, window_bounds = array<i64: 384, 128>}, {transform_indices = @transform_5, window_bounds = array<i64: 1, 2>}, {transform_indices = @transform_6, window_bounds = array<i64: 1, 1, 128>}]} {
    %c0 = arith.constant 0 : index
    %c0_0 = arith.constant 0 : index
    %0 = vector.load %arg1[%c0, %c0_0] : memref<128x32xf32, #tpu.memory_space<vmem>>, vector<128x32xf32>
    %1 = arith.truncf %0 : vector<128x32xf32> to vector<128x32xbf16>
    %c0_1 = arith.constant 0 : index
    %c0_2 = arith.constant 0 : index
    %2 = vector.load %arg2[%c0_1, %c0_2] : memref<32x384xbf16, #tpu.memory_space<vmem>>, vector<32x384xbf16>
    %cst = arith.constant dense<0.000000e+00> : vector<128x384xf32>
    %3 = tpu.matmul %1, %2, %cst {dimension_numbers = #tpu.dot_dimension_numbers<[1], [0], [0], [1], [0, 0, 1, 1], [], []>} : vector<128x32xbf16>, vector<32x384xbf16>, vector<128x384xf32> -> vector<128x384xf32>
    %c0_3 = arith.constant 0 : index
    %c0_4 = arith.constant 0 : index
    %4 = vector.load %arg3[%c0_3, %c0_4] : memref<1x384xf32, #tpu.memory_space<vmem>>, vector<1x384xf32>
    %5 = vector.broadcast %4 : vector<1x384xf32> to vector<128x384xf32>
    %6 = arith.addf %3, %5 : vector<128x384xf32>
    %cst_5 = arith.constant 0.000000e+00 : f32
    %7 = vector.broadcast %cst_5 : f32 to vector<128x384xf32>
    %8 = arith.maximumf %6, %7 : vector<128x384xf32>
    %9 = arith.truncf %8 : vector<128x384xf32> to vector<128x384xbf16>
    %c0_6 = arith.constant 0 : index
    %c0_7 = arith.constant 0 : index
    %10 = vector.load %arg4[%c0_6, %c0_7] : memref<384x128xbf16, #tpu.memory_space<vmem>>, vector<384x128xbf16>
    %cst_8 = arith.constant dense<0.000000e+00> : vector<128x128xf32>
    %11 = tpu.matmul %9, %10, %cst_8 {dimension_numbers = #tpu.dot_dimension_numbers<[1], [0], [0], [1], [0, 0, 1, 1], [], []>} : vector<128x384xbf16>, vector<384x128xbf16>, vector<128x128xf32> -> vector<128x128xf32>
    %12 = arith.mulf %9, %9 : vector<128x384xbf16>
    %c0_9 = arith.constant 0 : index
    %c0_10 = arith.constant 0 : index
    %13 = vector.load %arg5[%c0_9, %c0_10] : memref<384x128xbf16, #tpu.memory_space<vmem>>, vector<384x128xbf16>
    %cst_11 = arith.constant dense<0.000000e+00> : vector<128x128xf32>
    %14 = tpu.matmul %12, %13, %cst_11 {dimension_numbers = #tpu.dot_dimension_numbers<[1], [0], [0], [1], [0, 0, 1, 1], [], []>} : vector<128x384xbf16>, vector<384x128xbf16>, vector<128x128xf32> -> vector<128x128xf32>
    %15 = arith.addf %11, %14 : vector<128x128xf32>
    %16 = tpu.transpose %15, [1, 0] : vector<128x128xf32> -> vector<128x128xf32>
    %17 = vector.extract_strided_slice %16 {offsets = [0, 0], sizes = [1, 128], strides = [1, 1]} : vector<128x128xf32> to vector<1x128xf32>
    %18 = vector.extract_strided_slice %16 {offsets = [1, 0], sizes = [1, 128], strides = [1, 1]} : vector<128x128xf32> to vector<1x128xf32>
    %19 = vector.extract_strided_slice %16 {offsets = [2, 0], sizes = [1, 128], strides = [1, 1]} : vector<128x128xf32> to vector<1x128xf32>
    %cst_12 = arith.constant 0.00333333341 : f32
    %20 = vector.broadcast %cst_12 : f32 to vector<1x128xf32>
    %21 = arith.mulf %17, %20 : vector<1x128xf32>
    %cst_13 = arith.constant 0.00333333341 : f32
    %22 = vector.broadcast %cst_13 : f32 to vector<1x128xf32>
    %23 = arith.mulf %19, %22 : vector<1x128xf32>
    %24 = arith.mulf %21, %21 : vector<1x128xf32>
    %25 = arith.subf %23, %24 : vector<1x128xf32>
    %cst_14 = arith.constant 0.000000e+00 : f32
    %26 = vector.broadcast %cst_14 : f32 to vector<1x128xf32>
    %27 = arith.maximumf %25, %26 : vector<1x128xf32>
    %cst_15 = arith.constant 9.99999974E-6 : f32
    %28 = vector.broadcast %cst_15 : f32 to vector<1x128xf32>
    %29 = arith.addf %27, %28 : vector<1x128xf32>
    %30 = math.rsqrt %29 : vector<1x128xf32>
    %c0_16 = arith.constant 0 : index
    %c0_17 = arith.constant 0 : index
    %31 = memref.load %arg6[%c0_16, %c0_17] : memref<1x2xf32, #tpu.memory_space<smem>>
    %c0_18 = arith.constant 0 : index
    %c1 = arith.constant 1 : index
    %32 = memref.load %arg6[%c0_18, %c1] : memref<1x2xf32, #tpu.memory_space<smem>>
    %33 = vector.broadcast %32 : f32 to vector<1x128xf32>
    %34 = arith.mulf %21, %33 : vector<1x128xf32>
    %35 = arith.subf %18, %34 : vector<1x128xf32>
    %36 = arith.mulf %35, %30 : vector<1x128xf32>
    %37 = vector.broadcast %31 : f32 to vector<1x128xf32>
    %38 = arith.addf %36, %37 : vector<1x128xf32>
    %c0_19 = arith.constant 0 : index
    %c0_20 = arith.constant 0 : index
    %c0_21 = arith.constant 0 : index
    %39 = vector.load %arg7[%c0_19, %c0_20, %c0_21] : memref<1x1x128xf32, #tpu.memory_space<vmem>>, vector<1x1x128xf32>
    %40 = vector.shape_cast %39 : vector<1x1x128xf32> to vector<1x128xf32>
    %41 = vector.shape_cast %38 : vector<1x128xf32> to vector<1x1x128xf32>
    tpu.vector_store %arg7[%c0_19, %c0_20, %c0_21], %41 {strides = array<i32>} : memref<1x1x128xf32, #tpu.memory_space<vmem>>, vector<1x1x128xf32>,
    return
  }
  func.func @transform_0(%arg0: i32) -> (i32, i32) {
    %c0_i32 = arith.constant 0 : i32
    %c0_i32_0 = arith.constant 0 : i32
    return %arg0, %c0_i32 : i32, i32
  }
  func.func @transform_1(%arg0: i32) -> (i32, i32) {
    %c0_i32 = arith.constant 0 : i32
    %c0_i32_0 = arith.constant 0 : i32
    %c0_i32_1 = arith.constant 0 : i32
    return %c0_i32, %c0_i32_0 : i32, i32
  }
  func.func @transform_2(%arg0: i32) -> (i32, i32) {
    %c0_i32 = arith.constant 0 : i32
    %c0_i32_0 = arith.constant 0 : i32
    %c0_i32_1 = arith.constant 0 : i32
    return %c0_i32, %c0_i32_0 : i32, i32
  }
  func.func @transform_3(%arg0: i32) -> (i32, i32) {
    %c0_i32 = arith.constant 0 : i32
    %c0_i32_0 = arith.constant 0 : i32
    %c0_i32_1 = arith.constant 0 : i32
    return %c0_i32, %c0_i32_0 : i32, i32
  }
  func.func @transform_4(%arg0: i32) -> (i32, i32) {
    %c0_i32 = arith.constant 0 : i32
    %c0_i32_0 = arith.constant 0 : i32
    %c0_i32_1 = arith.constant 0 : i32
    return %c0_i32, %c0_i32_0 : i32, i32
  }
  func.func @transform_5(%arg0: i32) -> (i32, i32) {
    %c0_i32 = arith.constant 0 : i32
    %c0_i32_0 = arith.constant 0 : i32
    %c0_i32_1 = arith.constant 0 : i32
    return %c0_i32, %c0_i32_0 : i32, i32
  }
  func.func @transform_6(%arg0: i32) -> (i32, i32, i32) {
    %c0_i32 = arith.constant 0 : i32
    %c0_i32_0 = arith.constant 0 : i32
    %c0_i32_1 = arith.constant 0 : i32
    return %arg0, %c0_i32, %c0_i32_0 : i32, i32, i32
  }
}

</mosaic_0001>

<bundles_post_ra>
// kernel: tpu_custom_call.1
= control target key start
LH: loop header
LB: loop body
LE: loop exit
PB: predicated region body
PF: predicated region fallthrough
CT: control target
= control target key end

     0   :  { %11 = vsyncpa [#allocation3], 0  ;;  %s2233_s0 = inlined_call_operand.hbm [shape: f32[2,32], index: 0, kind: input, shape index: {}]   ;;  %s2234_s1 = inlined_call_operand.hbm [shape: bf16[32,384], index: 1, kind: input, shape index: {}]   ;;  %s2235_s2 = inlined_call_operand.vmem [shape: f32[1,384], index: 2, kind: input, shape index: {}]   ;;  %s2236_s3 = inlined_call_operand.hbm [shape: bf16[384,128], index: 3, kind: input, shape index: {}]   ;;  %s2237_s4 = inlined_call_operand.hbm [shape: bf16[384,128], index: 4, kind: input, shape index: {}]   ;;  %s2238_s5 = inlined_call_operand.vmem [shape: f32[1,2], index: 5, kind: input, shape index: {}]   ;;  %s2239_s6 = inlined_call_operand.hbm [shape: f32[1,1,128], index: 6, kind: output, shape index: {}]  }
   0x1   :  { %12 = vsyncpa [#allocation7], 0 }
   0x2   :  { %13 = vsyncpa [#allocation10], 0 }
   0x3   :  { %14 = vsyncpa [#allocation5], 0 }
   0x4   :  { %15 = vsyncpa [#allocation4], 0 }
   0x5   :  { %20 = vsyncadd [#allocation3], 2016  ;;  %s1927_s21 = smov [#allocation6]   ;;  %s1795_s25 = scalar_lea.hbm %s2234_s1, 768 }
   0x6   :  { %s33_s22 = sshll.u32 %s1927_s21, 4  ;;  %p1796_p0 = scmp.ne.s32.totalorder %s2234_s1, %s1795_s25  ;;  %s34_s22 = int_to_ptr.vmem [resolvable:$true] %s33_s22 }
   0x7   :  { %p1799_p1 = scmp.lt.u32.totalorder %s1795_s25, %s2234_s1 }
   0x9   :  { %p1801_p2 = pnand %p1799_p1, %p1796_p0 }
   0xb   :  { %1804 = shalt.err (!%p1801_p2)
}
   0xc   :  { %s1805_s30 = scalar_lea.vmem %s34_s22, 768  ;;  %p1810_p4 = scmp.lt.s32.totalorder %s34_s22, %s34_s22 }
   0xd   :  { %p1806_p3 = scmp.ne.s32.totalorder %s34_s22, %s1805_s30  ;;  %p1811_p5 = scmp.lt.s32.totalorder %s1805_s30, %s1805_s30 }
   0xf   :  { %p1812_p6 = por %p1811_p5, %p1810_p4 }
  0x11   :  { %p1813_p7 = pnand %p1812_p6, %p1806_p3 }
  0x13   :  { %1816 = shalt.err (!%p1813_p7)
}
  0x14   :  { %s1928_s7 = smov 192   ;;  %s1929_s8 = smov 12  }
  0x15   :  { %39 = dma.hbm_to_vmem [thread:$0]  %s2234_s1, 768, %s34_s22, [#allocation7], %s1928_s7, %s1928_s7, %s1929_s8  }
  0x16   :  { %s1930_s11 = smov [#allocation2]   ;;  %s1817_s15 = scalar_lea.hbm %s2233_s0, 32 }
  0x17   :  { %s21_s12 = sshll.u32 %s1930_s11, 4  ;;  %p1818_p8 = scmp.ne.s32.totalorder %s2233_s0, %s1817_s15  ;;  %s22_s12 = int_to_ptr.vmem [resolvable:$true] %s21_s12 }
  0x18   :  { %p1821_p9 = scmp.lt.u32.totalorder %s1817_s15, %s2233_s0 }
  0x1a   :  { %p1823_p10 = pnand %p1821_p9, %p1818_p8 }
  0x1c   :  { %1826 = shalt.err (!%p1823_p10)
}
  0x1d   :  { %s1827_s20 = scalar_lea.vmem %s22_s12, 32  ;;  %s1831_s1 = scalar_lea.vmem %s22_s12, 2048 }
  0x1e   :  { %p1828_p11 = scmp.ne.s32.totalorder %s22_s12, %s1827_s20  ;;  %p1832_p12 = scmp.lt.s32.totalorder %s22_s12, %s22_s12 }
  0x1f   :  { %p1833_p13 = scmp.lt.s32.totalorder %s1831_s1, %s1827_s20 }
  0x21   :  { %p1834_p0 = por %p1833_p13, %p1832_p12 }
  0x23   :  { %p1835_p1 = pnand %p1834_p0, %p1828_p11 }
  0x25   :  { %1838 = shalt.err (!%p1835_p1)
}
  0x26   :  { %s1931_s21 = smov 32   ;;  %s1932_s22 = smov 2  }
  0x27   :  { %27 = dma.hbm_to_vmem [thread:$0]  %s2233_s0, 32, %s22_s12, [#allocation3], %s1931_s21, %s1931_s21, %s1932_s22  }
  0x28   :  { %s1933_s25 = smov [#allocation8]   ;;  %s1839_s29 = scalar_lea.hbm %s2236_s3, 3072 }
  0x29   :  { %s47_s26 = sshll.u32 %s1933_s25, 4  ;;  %p1840_p2 = scmp.ne.s32.totalorder %s2236_s3, %s1839_s29  ;;  %s48_s26 = int_to_ptr.vmem [resolvable:$true] %s47_s26 }
  0x2a   :  { %p1843_p3 = scmp.lt.u32.totalorder %s1839_s29, %s2236_s3 }
  0x2c   :  { %p1845_p4 = pnand %p1843_p3, %p1840_p2 }
  0x2e   :  { %1848 = shalt.err (!%p1845_p4)
}
  0x2f   :  { %s1849_s10 = scalar_lea.vmem %s48_s26, 3072  ;;  %p1854_p6 = scmp.lt.s32.totalorder %s48_s26, %s48_s26 }
  0x30   :  { %p1850_p5 = scmp.ne.s32.totalorder %s48_s26, %s1849_s10  ;;  %p1855_p7 = scmp.lt.s32.totalorder %s1849_s10, %s1849_s10 }
  0x32   :  { %p1856_p8 = por %p1855_p7, %p1854_p6 }
  0x34   :  { %p1857_p9 = pnand %p1856_p8, %p1850_p5 }
  0x36   :  { %1860 = shalt.err (!%p1857_p9)
}
  0x37   :  { %s1934_s0 = smov 64   ;;  %s1935_s11 = smov 4  }
  0x38   :  { %53 = dma.hbm_to_vmem [thread:$0]  %s2236_s3, 3072, %s48_s26, [#allocation7], %s1934_s0, %s1934_s0, %s1935_s11  }
  0x39   :  { %s1936_s14 = smov [#allocation9]   ;;  %s72_s18 = sshll.u32 %s2238_s5, 4  ;;  %s73_s18 = int_to_ptr.vmem [resolvable:$true] %s72_s18 }
  0x3a   :  { %s59_s15 = sshll.u32 %s1936_s14, 4  ;;  %s1861_s1 = scalar_lea.hbm %s2237_s4, 3072  ;;  %s60_s15 = int_to_ptr.vmem [resolvable:$true] %s59_s15 }
  0x3b   :  { %p1862_p10 = scmp.ne.s32.totalorder %s2237_s4, %s1861_s1  ;;  %p1865_p11 = scmp.lt.u32.totalorder %s1861_s1, %s2237_s4 }
  0x3d   :  { %p1867_p12 = pnand %p1865_p11, %p1862_p10 }
  0x3f   :  { %1870 = shalt.err (!%p1867_p12)
}
  0x40   :  { %s1871_s3 = scalar_lea.vmem %s60_s15, 3072  ;;  %p1876_p0 = scmp.lt.s32.totalorder %s60_s15, %s60_s15 }
  0x41   :  { %p1872_p13 = scmp.ne.s32.totalorder %s60_s15, %s1871_s3  ;;  %p1877_p1 = scmp.lt.s32.totalorder %s1871_s3, %s1871_s3 }
  0x43   :  { %p1878_p2 = por %p1877_p1, %p1876_p0 }
  0x45   :  { %p1879_p3 = pnand %p1878_p2, %p1872_p13 }
  0x47   :  { %1882 = shalt.err (!%p1879_p3)
}
  0x48   :  { %65 = dma.hbm_to_vmem [thread:$0]  %s2237_s4, 3072, %s60_s15, [#allocation10], %s1934_s0, %s1934_s0, %s1935_s11  }
  0x49   :  { %s1883_s26 = scalar_lea.vmem %s73_s18, 16  ;;  %p1888_p5 = scmp.lt.s32.totalorder %s73_s18, %s73_s18 }
  0x4a   :  { %p1884_p4 = scmp.ne.s32.totalorder %s73_s18, %s1883_s26  ;;  %p1889_p6 = scmp.lt.s32.totalorder %s1883_s26, %s1883_s26 }
  0x4c   :  { %p1890_p7 = por %p1889_p6, %p1888_p5 }
  0x4e   :  { %p1891_p8 = pnand %p1890_p7, %p1884_p4 }
  0x50   :  { %1894 = shalt.err (!%p1891_p8)
}
  0x51   :  { %s1937_s27 = smov [#allocation11]  }
  0x52   :  { %75 = dma.vmem_to_smem %s73_s18, 16, %s1937_s27, [#allocation5]  }
  0x53   :  { %1917 = dma.done.wait [#allocation3], 2048  }
  0x54   :  { %1918 = vsyncadd [#allocation3], 4294965248 }
  0x55   :  { %1919 = dma.done.wait [#allocation7], 3840  }
  0x56   :  { %1920 = vsyncadd [#allocation7], 4294963456 }
  0x57   :  { %1921 = dma.done.wait [#allocation10], 3072  }
  0x58   :  { %1922 = vsyncadd [#allocation10], 4294964224 }
  0x59   :  { %1923 = dma.done.wait [#allocation5], 16  }
  0x5a   :  { %1924 = vsyncadd [#allocation5], 4294967280 }
  0x5b   :  { %91 = sfence }
  0x5c   :  { %v1737_v0 = vld [vmem:[#allocation6 + $0x4] ss:$12 sps:$4 sm:$0xff]   ;;  %v1739_v1 = vld [vmem:[#allocation6] ss:$12 sps:$4 sm:$0xff]   ;;  %v1938_v2 = vmov 0   ;;  %vm174_vm0 = vcmask 261120   ;;  %v127_v50 = vlaneseq }
  0x5d   :  { %231 = vmatprep.mubr.bf16.mxu1 %v1938_v2  ;;  %199 = vmatprep.subr.bf16.mxu1 %v1737_v0  ;;  %v1740_v3 = vld [vmem:[#allocation6 + $0x1c] ss:$12 sps:$4 sm:$0xff]   ;;  %v1742_v4 = vld [vmem:[#allocation6 + $0x18] ss:$12 sps:$4 sm:$0xff]   ;;  %v1744_v9 = vld [vmem:[#allocation6 + $0x20] ss:$12 sps:$4 sm:$0xff]  }
  0x5e   :  { %v93_v5 = vld [vmem:[#allocation2] sm:$0xff]  ;;  %200 = vmatpush1.bf16.msra.mxu1 %v1739_v1  ;;  %v94_v6 = vld [vmem:[#allocation2 + $0x8] sm:$0xff]  ;;  %v95_v10 = vld [vmem:[#allocation2 + $0x10] sm:$0xff]  ;;  %v128_v52 = vshrl.u32 %v127_v50, 7  ;;  %s1318_s29 = sld [smem:[#allocation11]]  ;;  %s1939_s30 = smov [#allocation12]  }
  0x5f   :  { %201 = vmatprep.subr.bf16.mxu1 %v1740_v3  ;;  %v1743_v7 = vld [vmem:[#allocation6 + $0x8] ss:$12 sps:$4 sm:$0xff]   ;;  %v109_v8 = vpack.c.bf16 %v94_v6, %v93_v5  ;;  %v96_v11 = vld [vmem:[#allocation2 + $0x18] sm:$0xff]  ;;  %v97_v14 = vld [vmem:[#allocation2 + $0x20] sm:$0xff]  ;;  %s1339_s7 = sshll.u32 %s1939_s30, 4  ;;  %s1340_s7 = int_to_ptr.vmem [resolvable:$true] %s1339_s7 }
  0x60   :  { %v1745_v12 = vld [vmem:[#allocation9 + $0x40] sm:$0xff]   ;;  %v110_v13 = vpack.c.bf16 %v96_v11, %v95_v10  ;;  %v98_v15 = vld [vmem:[#allocation2 + $0x28] sm:$0xff]  ;;  %v100_v18 = vld [vmem:[#allocation2 + $0x38] sm:$0xff]  ;;  %v137_v54 = vsub.s32 2, %v128_v52  ;;  %v129_v61 = vsub.s32 0, %v128_v52  ;;  %v133_v62 = vsub.s32 1, %v128_v52  ;;  %p1900_p10 = scmp.lt.s32.totalorder %s1340_s7, %s1340_s7 }
  0x61   :  { %v111_v16 = vpack.c.bf16 %v98_v15, %v97_v14  ;;  %v99_v17 = vld [vmem:[#allocation2 + $0x30] sm:$0xff]  ;;  %v101_v20 = vld [vmem:[#allocation2 + $0x40] sm:$0xff]  ;;  %v102_v21 = vld [vmem:[#allocation2 + $0x48] sm:$0xff]  ;;  %s1895_s8 = scalar_lea.vmem %s1340_s7, 16  ;;  %s1899_s9 = scalar_lea.vmem %s1340_s7, 32 }
  0x62   :  { %202 = vmatpush1.bf16.msra.mxu1 %v1742_v4  ;;  %v112_v19 = vpack.c.bf16 %v100_v18, %v99_v17  ;;  %v113_v22 = vpack.c.bf16 %v102_v21, %v101_v20  ;;  %v103_v23 = vld [vmem:[#allocation2 + $0x50] sm:$0xff]  ;;  %v104_v24 = vld [vmem:[#allocation2 + $0x58] sm:$0xff]  ;;  %v105_v26 = vld [vmem:[#allocation2 + $0x60] sm:$0xff]  ;;  %p1896_p9 = scmp.ne.s32.totalorder %s1340_s7, %s1895_s8  ;;  %p1901_p11 = scmp.lt.s32.totalorder %s1899_s9, %s1895_s8 }
  0x63   :  { %1592 = vmatprep.subr.bf16.mxu1 %v1743_v7  ;;  %v114_v25 = vpack.c.bf16 %v104_v24, %v103_v23  ;;  %v106_v27 = vld [vmem:[#allocation2 + $0x68] sm:$0xff]  ;;  %v107_v29 = vld [vmem:[#allocation2 + $0x70] sm:$0xff]  ;;  %v108_v30 = vld [vmem:[#allocation2 + $0x78] sm:$0xff] }
  0x64   :  { %v115_v28 = vpack.c.bf16 %v106_v27, %v105_v26  ;;  %v116_v31 = vpack.c.bf16 %v108_v30, %v107_v29  ;;  %v1746_v32 = vld [vmem:[#allocation9] sm:$0xff]   ;;  %v1747_v33 = vld [vmem:[#allocation9 + $0x48] sm:$0xff]   ;;  %v1749_v35 = vld [vmem:[#allocation9 + $0x50] sm:$0xff]   ;;  %p1902_p12 = por %p1901_p11, %p1900_p10 }
  0x65   :  { %1357 = vmatmul.mubr.msk.bf16.vlgmr.msra.gmra.mrb[0].mxu1 %vm174_vm0, %v109_v8  ;;  %v1748_v34 = vld [vmem:[#allocation9 + $0x8] sm:$0xff]   ;;  %v1750_v36 = vld [vmem:[#allocation9 + $0x10] sm:$0xff]   ;;  %v1751_v37 = vld [vmem:[#allocation9 + $0x58] sm:$0xff]  }
  0x66   :  { %1593 = vmatpush3.bf16.msra.mxu1 %v1743_v7  ;;  %241 = vmatprep.mubr.bf16.mxu1 %v1938_v2  ;;  %v1752_v38 = vld [vmem:[#allocation9 + $0x18] sm:$0xff]   ;;  %v1753_v39 = vld [vmem:[#allocation9 + $0x60] sm:$0xff]   ;;  %v1755_v41 = vld [vmem:[#allocation9 + $0x68] sm:$0xff]   ;;  %p1903_p13 = pnand %p1902_p12, %p1896_p9 }
  0x67   :  { %1594 = vmatprep.subr.bf16.mxu1 %v1744_v9  ;;  %v1754_v40 = vld [vmem:[#allocation9 + $0x20] sm:$0xff]   ;;  %v1756_v42 = vld [vmem:[#allocation9 + $0x28] sm:$0xff]   ;;  %v1757_v43 = vld [vmem:[#allocation9 + $0x70] sm:$0xff]  }
  0x68   :  { %v1758_v44 = vld [vmem:[#allocation9 + $0x30] sm:$0xff]   ;;  %v1759_v45 = vld [vmem:[#allocation9 + $0x78] sm:$0xff]   ;;  %v1761_v47 = vld [vmem:[#allocation9 + $0x80] sm:$0xff]  }
  0x69   :  { %v1760_v46 = vld [vmem:[#allocation9 + $0x38] sm:$0xff]   ;;  %1612 = vmatprep.subr.bf16.mxu0 %v1761_v47  ;;  %v1762_v48 = vld [vmem:[#allocation9 + $0x88] sm:$0xff]   ;;  %v1763_v49 = vld [vmem:[#allocation9 + $0x90] sm:$0xff]  }
  0x6a   :  { %1595 = vmatpush3.bf16.msra.mxu1 %v1744_v9  ;;  %1613 = vmatpush3.bf16.msra.mxu0 %v1761_v47  ;;  %v1764_v51 = vld [vmem:[#allocation9 + $0x98] sm:$0xff]   ;;  %v1765_v53 = vld [vmem:[#allocation9 + $0xa0] sm:$0xff]   ;;  %v125_v55 = vld [vmem:[%s2235_s2] sm:$0x7]  ;;  %s1421_s2 = sld [smem:[#allocation11 + $0x1]] }
  0x6b   :  { %1432 = vmatprep.subr.bf16.mxu1 %v1745_v12  ;;  %1614 = vmatprep.subr.bf16.mxu0 %v1762_v48  ;;  %v2045_v56 = vrot.slane %v125_v55, %v137_v54  ;;  %v1766_v57 = vld [vmem:[#allocation9 + $0xa8] sm:$0xff]   ;;  %v1767_v58 = vld [vmem:[#allocation9 + $0xb0] sm:$0xff]   ;;  %v1768_v59 = vld [vmem:[#allocation9 + $0xb8] sm:$0xff]   ;;  %v2047_v63 = vrot.slane %v125_v55, %v129_v61  ;;  %v2049_v0 = vrot.slane %v125_v55, %v133_v62 }
  0x6c   :  { %v1769_v60 = vld [vmem:[#allocation8 + $0x40] sm:$0xff]  }
  0x6d   :  { %1358 = vmatmul.mubr.msk.bf16.gmra.mrb[4].mxu1 %vm174_vm0, %v110_v13 }
  0x6e   :  { %251 = vmatprep.mubr.bf16.mxu1 %v1938_v2  ;;  %1615 = vmatpush3.bf16.msra.mxu0 %v1762_v48 }
  0x6f   :  { %1616 = vmatprep.subr.bf16.mxu0 %v1763_v49 }
  0x72   :  { %1617 = vmatpush3.bf16.msra.mxu0 %v1763_v49 }
  0x73   :  { %1618 = vmatprep.subr.bf16.mxu0 %v1764_v51 }
  0x75   :  { %1359 = vmatmul.mubr.msk.bf16.gmra.mrb[8].mxu1 %vm174_vm0, %v111_v16 }
  0x76   :  { %261 = vmatprep.mubr.bf16.mxu1 %v1938_v2  ;;  %1619 = vmatpush3.bf16.msra.mxu0 %v1764_v51 }
  0x77   :  { %1620 = vmatprep.subr.bf16.mxu0 %v1765_v53 }
  0x7a   :  { %1621 = vmatpush3.bf16.msra.mxu0 %v1765_v53 }
  0x7b   :  { %1622 = vmatprep.subr.bf16.mxu0 %v1766_v57 }
  0x7d   :  { %1360 = vmatmul.mubr.msk.bf16.gmra.mrb[12].mxu1 %vm174_vm0, %v112_v19 }
  0x7e   :  { %271 = vmatprep.mubr.bf16.mxu1 %v1938_v2  ;;  %1623 = vmatpush3.bf16.msra.mxu0 %v1766_v57 }
  0x7f   :  { %1624 = vmatprep.subr.bf16.mxu0 %v1767_v58 }
  0x82   :  { %1625 = vmatpush3.bf16.msra.mxu0 %v1767_v58 }
  0x83   :  { %1626 = vmatprep.subr.bf16.mxu0 %v1768_v59 }
  0x85   :  { %1361 = vmatmul.mubr.msk.bf16.gmra.mrb[16].mxu1 %vm174_vm0, %v113_v22 }
  0x86   :  { %281 = vmatprep.mubr.bf16.mxu1 %v1938_v2  ;;  %1627 = vmatpush3.bf16.msra.mxu0 %v1768_v59 }
  0x87   :  { %1512 = vmatprep.subr.bf16.mxu0 %v1769_v60 }
  0x8d   :  { %1362 = vmatmul.mubr.msk.bf16.gmra.mrb[20].mxu1 %vm174_vm0, %v114_v25 }
  0x8e   :  { %291 = vmatprep.mubr.bf16.mxu1 %v1938_v2 }
  0x95   :  { %1363 = vmatmul.mubr.msk.bf16.gmra.mrb[24].mxu1 %vm174_vm0, %v115_v28 }
  0x96   :  { %301 = vmatprep.mubr.bf16.mxu1 %v1938_v2 }
  0x9d   :  { %1364 = vmatmul.mubr.msk.bf16.gmra.mrb[28].mxu1 %vm174_vm0, %v116_v31 }
  0x9e   :  { %1596 = vmatprep.mubr.msk.bf16.mxu1 %vm174_vm0, %v109_v8 }
  0xa5   :  { %1597 = vmatmul.mubr.msk.bf16.vlgmr.msra.gmra.mrb[32].mxu1 %vm174_vm0, %v110_v13 }
  0xa6   :  { %1600 = vmatprep.mubr.msk.bf16.mxu1 %vm174_vm0, %v111_v16  ;;  %1433 = vmatpush3.bf16.msra.mxu1 %v1746_v32 }
  0xa7   :  { %1434 = vmatprep.subr.bf16.mxu1 %v1747_v33 }
  0xaa   :  { %1435 = vmatpush3.bf16.msra.mxu1 %v1748_v34 }
  0xab   :  { %1436 = vmatprep.subr.bf16.mxu1 %v1749_v35 }
  0xad   :  { %1601 = vmatmul.mubr.msk.bf16.gmra.mrb[36].mxu1 %vm174_vm0, %v112_v19 }
  0xae   :  { %1604 = vmatprep.mubr.msk.bf16.mxu1 %vm174_vm0, %v113_v22  ;;  %1437 = vmatpush3.bf16.msra.mxu1 %v1750_v36 }
  0xaf   :  { %1438 = vmatprep.subr.bf16.mxu1 %v1751_v37 }
  0xb2   :  { %1439 = vmatpush3.bf16.msra.mxu1 %v1752_v38 }
  0xb3   :  { %1440 = vmatprep.subr.bf16.mxu1 %v1753_v39 }
  0xb5   :  { %1605 = vmatmul.mubr.msk.bf16.gmra.mrb[40].mxu1 %vm174_vm0, %v114_v25 }
  0xb6   :  { %1608 = vmatprep.mubr.msk.bf16.mxu1 %vm174_vm0, %v115_v28  ;;  %1441 = vmatpush3.bf16.msra.mxu1 %v1754_v40 }
  0xb7   :  { %1442 = vmatprep.subr.bf16.mxu1 %v1755_v41 }
  0xba   :  { %1443 = vmatpush3.bf16.msra.mxu1 %v1756_v42 }
  0xbb   :  { %1444 = vmatprep.subr.bf16.mxu1 %v1757_v43 }
  0xbd   :  { %1609 = vmatmul.mubr.msk.bf16.gmra.mrb[44].mxu1 %vm174_vm0, %v116_v31 }
  0xbe   :  { %1445 = vmatpush3.bf16.msra.mxu1 %v1758_v44 }
  0xbf   :  { %1446 = vmatprep.subr.bf16.mxu1 %v1759_v45 }
  0xc2   :  { %1447 = vmatpush3.bf16.msra.mxu1 %v1760_v46 }
 0x138   :  { %v233_v1 = vpop.f32.mrb[0].mxu1 }
 0x139   :  { %v234_v2 = vadd.f32 %v233_v1, %v2047_v63  ;;  %v235_v3 = vpop.f32.mrb[1].mxu1 }
 0x13a   :  { %v236_v4 = vadd.f32 %v235_v3, %v2049_v0  ;;  %v237_v5 = vpop.f32.mrb[2].mxu1 }
 0x13b   :  { %v238_v6 = vadd.f32 %v237_v5, %v2047_v63  ;;  %v239_v7 = vpop.f32.mrb[3].mxu1  ;;  %v409_v9 = vmax.f32 %v234_v2, 0.0 }
 0x13c   :  { %v240_v8 = vadd.f32 %v239_v7, %v2049_v0  ;;  %v410_v11 = vmax.f32 %v236_v4, 0.0 }
 0x13d   :  { %v412_v10 = vmax.f32 %v238_v6, 0.0 }
 0x13e   :  { %v413_v12 = vmax.f32 %v240_v8, 0.0 }
 0x13f   :  { %v2055_v13 = vpack.c.bf16 %v412_v10, %v409_v9 }
 0x140   :  { %v2057_v14 = vpack.c.bf16 %v413_v12, %v410_v11  ;;  %v243_v15 = vpop.f32.mrb[4].mxu1 }
 0x141   :  { %v244_v16 = vadd.f32 %v243_v15, %v2047_v63  ;;  %v245_v17 = vpop.f32.mrb[5].mxu1  ;;  %v529_v21 = vmul.bf16 %v2055_v13, %v2055_v13 }
 0x142   :  { %v246_v18 = vadd.f32 %v245_v17, %v2049_v0  ;;  %v247_v19 = vpop.f32.mrb[6].mxu1  ;;  %v530_v20 = vmul.bf16 %v2057_v14, %v2057_v14 }
 0x143   :  { %v248_v22 = vadd.f32 %v247_v19, %v2047_v63  ;;  %v249_v23 = vpop.f32.mrb[7].mxu1  ;;  %v415_v25 = vmax.f32 %v244_v16, 0.0 }
 0x144   :  { %v250_v24 = vadd.f32 %v249_v23, %v2049_v0  ;;  %777 = vmatprep.mubr.bf16.mxu1 %v530_v20  ;;  %v416_v27 = vmax.f32 %v246_v18, 0.0 }
 0x145   :  { %v418_v26 = vmax.f32 %v248_v22, 0.0  ;;  %778 = vmatmul.mubr.bf16.vlgmr.msra.gmra.mrb[48].mxu1 %v529_v21 }
 0x146   :  { %v419_v28 = vmax.f32 %v250_v24, 0.0 }
 0x147   :  { %v2067_v29 = vpack.c.bf16 %v418_v26, %v415_v25 }
 0x148   :  { %v2069_v30 = vpack.c.bf16 %v419_v28, %v416_v27  ;;  %v253_v31 = vpop.f32.mrb[8].mxu1 }
 0x149   :  { %v254_v32 = vadd.f32 %v253_v31, %v2047_v63  ;;  %v255_v33 = vpop.f32.mrb[9].mxu1  ;;  %v532_v39 = vmul.bf16 %v2067_v29, %v2067_v29 }
 0x14a   :  { %v256_v34 = vadd.f32 %v255_v33, %v2049_v0  ;;  %v257_v35 = vpop.f32.mrb[10].mxu1  ;;  %v533_v36 = vmul.bf16 %v2069_v30, %v2069_v30 }
 0x14b   :  { %v258_v37 = vadd.f32 %v257_v35, %v2047_v63  ;;  %v259_v38 = vpop.f32.mrb[11].mxu1  ;;  %v421_v41 = vmax.f32 %v254_v32, 0.0 }
 0x14c   :  { %v260_v40 = vadd.f32 %v259_v38, %v2049_v0  ;;  %785 = vmatprep.mubr.bf16.mxu1 %v533_v36  ;;  %v422_v43 = vmax.f32 %v256_v34, 0.0 }
 0x14d   :  { %v424_v42 = vmax.f32 %v258_v37, 0.0  ;;  %786 = vmatmul.mubr.bf16.gmra.mrb[52].mxu1 %v532_v39 }
 0x14e   :  { %v425_v44 = vmax.f32 %v260_v40, 0.0 }
 0x14f   :  { %v2079_v45 = vpack.c.bf16 %v424_v42, %v421_v41 }
 0x150   :  { %v2081_v46 = vpack.c.bf16 %v425_v44, %v422_v43  ;;  %v263_v47 = vpop.f32.mrb[12].mxu1 }
 0x151   :  { %v264_v48 = vadd.f32 %v263_v47, %v2047_v63  ;;  %v265_v49 = vpop.f32.mrb[13].mxu1  ;;  %v535_v55 = vmul.bf16 %v2079_v45, %v2079_v45 }
 0x152   :  { %v266_v50 = vadd.f32 %v265_v49, %v2049_v0  ;;  %v267_v51 = vpop.f32.mrb[14].mxu1  ;;  %v536_v52 = vmul.bf16 %v2081_v46, %v2081_v46 }
 0x153   :  { %v268_v53 = vadd.f32 %v267_v51, %v2047_v63  ;;  %v269_v54 = vpop.f32.mrb[15].mxu1  ;;  %v427_v58 = vmax.f32 %v264_v48, 0.0 }
 0x154   :  { %v270_v57 = vadd.f32 %v269_v54, %v2049_v0  ;;  %793 = vmatprep.mubr.bf16.mxu1 %v536_v52  ;;  %v428_v60 = vmax.f32 %v266_v50, 0.0 }
 0x155   :  { %v430_v59 = vmax.f32 %v268_v53, 0.0  ;;  %794 = vmatmul.mubr.bf16.gmra.mrb[56].mxu1 %v535_v55 }
 0x156   :  { %v431_v61 = vmax.f32 %v270_v57, 0.0 }
 0x157   :  { %v2091_v62 = vpack.c.bf16 %v430_v59, %v427_v58 }
 0x158   :  { %v2093_v1 = vpack.c.bf16 %v431_v61, %v428_v60  ;;  %v273_v2 = vpop.f32.mrb[16].mxu1 }
 0x159   :  { %v274_v3 = vadd.f32 %v273_v2, %v2047_v63  ;;  %v275_v4 = vpop.f32.mrb[17].mxu1  ;;  %v538_v10 = vmul.bf16 %v2091_v62, %v2091_v62 }
 0x15a   :  { %v276_v5 = vadd.f32 %v275_v4, %v2049_v0  ;;  %v277_v6 = vpop.f32.mrb[18].mxu1  ;;  %v539_v7 = vmul.bf16 %v2093_v1, %v2093_v1 }
 0x15b   :  { %v278_v8 = vadd.f32 %v277_v6, %v2047_v63  ;;  %v279_v9 = vpop.f32.mrb[19].mxu1  ;;  %v433_v12 = vmax.f32 %v274_v3, 0.0 }
 0x15c   :  { %v280_v11 = vadd.f32 %v279_v9, %v2049_v0  ;;  %801 = vmatprep.mubr.bf16.mxu1 %v539_v7  ;;  %v434_v16 = vmax.f32 %v276_v5, 0.0 }
 0x15d   :  { %v436_v15 = vmax.f32 %v278_v8, 0.0  ;;  %802 = vmatmul.mubr.bf16.gmra.mrb[60].mxu1 %v538_v10 }
 0x15e   :  { %v437_v17 = vmax.f32 %v280_v11, 0.0 }
 0x15f   :  { %v2103_v18 = vpack.c.bf16 %v436_v15, %v433_v12 }
 0x160   :  { %v2105_v19 = vpack.c.bf16 %v437_v17, %v434_v16  ;;  %v283_v20 = vpop.f32.mrb[20].mxu1 }
 0x161   :  { %v284_v21 = vadd.f32 %v283_v20, %v2047_v63  ;;  %v285_v22 = vpop.f32.mrb[21].mxu1  ;;  %v541_v28 = vmul.bf16 %v2103_v18, %v2103_v18 }
 0x162   :  { %v286_v23 = vadd.f32 %v285_v22, %v2049_v0  ;;  %v287_v24 = vpop.f32.mrb[22].mxu1  ;;  %v542_v25 = vmul.bf16 %v2105_v19, %v2105_v19 }
 0x163   :  { %v288_v26 = vadd.f32 %v287_v24, %v2047_v63  ;;  %v289_v27 = vpop.f32.mrb[23].mxu1  ;;  %v439_v32 = vmax.f32 %v284_v21, 0.0 }
 0x164   :  { %v290_v31 = vadd.f32 %v289_v27, %v2049_v0  ;;  %809 = vmatprep.mubr.bf16.mxu1 %v542_v25  ;;  %v440_v34 = vmax.f32 %v286_v23, 0.0 }
 0x165   :  { %v442_v33 = vmax.f32 %v288_v26, 0.0  ;;  %810 = vmatmul.mubr.bf16.gmra.mrb[64].mxu1 %v541_v28 }
 0x166   :  { %v443_v35 = vmax.f32 %v290_v31, 0.0 }
 0x167   :  { %v2115_v36 = vpack.c.bf16 %v442_v33, %v439_v32 }
 0x168   :  { %v2117_v37 = vpack.c.bf16 %v443_v35, %v440_v34  ;;  %v293_v38 = vpop.f32.mrb[24].mxu1 }
 0x169   :  { %v294_v39 = vadd.f32 %v293_v38, %v2047_v63  ;;  %v295_v40 = vpop.f32.mrb[25].mxu1  ;;  %v544_v48 = vmul.bf16 %v2115_v36, %v2115_v36 }
 0x16a   :  { %v296_v41 = vadd.f32 %v295_v40, %v2049_v0  ;;  %v297_v42 = vpop.f32.mrb[26].mxu1  ;;  %v545_v43 = vmul.bf16 %v2117_v37, %v2117_v37 }
 0x16b   :  { %v298_v44 = vadd.f32 %v297_v42, %v2047_v63  ;;  %v299_v47 = vpop.f32.mrb[27].mxu1  ;;  %v445_v50 = vmax.f32 %v294_v39, 0.0 }
 0x16c   :  { %v300_v49 = vadd.f32 %v299_v47, %v2049_v0  ;;  %817 = vmatprep.mubr.bf16.mxu1 %v545_v43  ;;  %v446_v52 = vmax.f32 %v296_v41, 0.0  ;;  %v1770_v41 = vld [vmem:[#allocation8] sm:$0xff]   ;;  %v1771_v47 = vld [vmem:[#allocation8 + $0x48] sm:$0xff]  }
 0x16d   :  { %v448_v51 = vmax.f32 %v298_v44, 0.0  ;;  %818 = vmatmul.mubr.bf16.gmra.mrb[68].mxu1 %v544_v48 }
 0x16e   :  { %v449_v53 = vmax.f32 %v300_v49, 0.0 }
 0x16f   :  { %v2127_v54 = vpack.c.bf16 %v448_v51, %v445_v50 }
 0x170   :  { %v2129_v55 = vpack.c.bf16 %v449_v53, %v446_v52  ;;  %v303_v57 = vpop.f32.mrb[28].mxu1  ;;  %v1772_v53 = vld [vmem:[#allocation8 + $0x8] sm:$0xff]  }
 0x171   :  { %v304_v58 = vadd.f32 %v303_v57, %v2047_v63  ;;  %v305_v59 = vpop.f32.mrb[29].mxu1  ;;  %v547_v5 = vmul.bf16 %v2127_v54, %v2127_v54 }
 0x172   :  { %v306_v60 = vadd.f32 %v305_v59, %v2049_v0  ;;  %v307_v61 = vpop.f32.mrb[30].mxu1  ;;  %v548_v2 = vmul.bf16 %v2129_v55, %v2129_v55 }
 0x173   :  { %v308_v3 = vadd.f32 %v307_v61, %v2047_v63  ;;  %v309_v4 = vpop.f32.mrb[31].mxu1  ;;  %v451_v7 = vmax.f32 %v304_v58, 0.0  ;;  %v1773_v58 = vld [vmem:[#allocation8 + $0x50] sm:$0xff]  }
 0x174   :  { %v310_v6 = vadd.f32 %v309_v4, %v2049_v0  ;;  %825 = vmatprep.mubr.bf16.mxu1 %v548_v2  ;;  %v452_v9 = vmax.f32 %v306_v60, 0.0 }
 0x175   :  { %v454_v8 = vmax.f32 %v308_v3, 0.0  ;;  %826 = vmatmul.mubr.bf16.gmra.mrb[72].mxu1 %v547_v5 }
 0x176   :  { %v455_v10 = vmax.f32 %v310_v6, 0.0  ;;  %v1774_v6 = vld [vmem:[#allocation8 + $0x10] sm:$0xff]  }
 0x177   :  { %v2139_v11 = vpack.c.bf16 %v454_v8, %v451_v7 }
 0x178   :  { %v2141_v12 = vpack.c.bf16 %v455_v10, %v452_v9  ;;  %v1598_v15 = vpop.f32.mrb[32].mxu1  ;;  %v1775_v10 = vld [vmem:[#allocation8 + $0x58] sm:$0xff]  }
 0x179   :  { %v355_v16 = vadd.f32 %v1598_v15, %v2045_v56  ;;  %v346_v63 = vpop.f32.mrb[33].mxu1  ;;  %v550_v23 = vmul.bf16 %v2139_v11, %v2139_v11 }
 0x17a   :  { %v347_v17 = vadd.f32 %v346_v63, %v2045_v56  ;;  %v1599_v20 = vpop.f32.mrb[34].mxu1  ;;  %v551_v0 = vmul.bf16 %v2141_v12, %v2141_v12 }
 0x17b   :  { %v358_v21 = vadd.f32 %v1599_v20, %v2045_v56  ;;  %v349_v22 = vpop.f32.mrb[35].mxu1  ;;  %v417_v25 = vmax.f32 %v355_v16, 0.0 }
 0x17c   :  { %v350_v24 = vadd.f32 %v349_v22, %v2045_v56  ;;  %833 = vmatprep.mubr.bf16.mxu1 %v551_v0  ;;  %v411_v27 = vmax.f32 %v347_v17, 0.0  ;;  %v1776_v0 = vld [vmem:[#allocation8 + $0x18] sm:$0xff]   ;;  %v1777_v22 = vld [vmem:[#allocation8 + $0x60] sm:$0xff]  }
 0x17d   :  { %v420_v26 = vmax.f32 %v358_v21, 0.0  ;;  %834 = vmatmul.mubr.bf16.gmra.mrb[76].mxu1 %v550_v23 }
 0x17e   :  { %v414_v28 = vmax.f32 %v350_v24, 0.0 }
 0x17f   :  { %v2151_v31 = vpack.c.bf16 %v420_v26, %v417_v25 }
 0x180   :  { %v1602_v32 = vpop.f32.mrb[36].mxu1  ;;  %v2153_v33 = vpack.c.bf16 %v414_v28, %v411_v27 }
 0x181   :  { %v371_v34 = vadd.f32 %v1602_v32, %v2045_v56  ;;  %v362_v35 = vpop.f32.mrb[37].mxu1  ;;  %v534_v44 = vmul.bf16 %v2151_v31, %v2151_v31 }
 0x182   :  { %v363_v38 = vadd.f32 %v362_v35, %v2045_v56  ;;  %v1603_v39 = vpop.f32.mrb[38].mxu1  ;;  %v531_v40 = vmul.bf16 %v2153_v33, %v2153_v33 }
 0x183   :  { %v374_v42 = vadd.f32 %v1603_v39, %v2045_v56  ;;  %v365_v43 = vpop.f32.mrb[39].mxu1  ;;  %v429_v49 = vmax.f32 %v371_v34, 0.0  ;;  %v1778_v34 = vld [vmem:[#allocation8 + $0x20] sm:$0xff]  }
 0x184   :  { %v366_v48 = vadd.f32 %v365_v43, %v2045_v56  ;;  %1628 = vmatprep.mubr.bf16.mxu0 %v531_v40  ;;  %v423_v51 = vmax.f32 %v363_v38, 0.0  ;;  %v1779_v40 = vld [vmem:[#allocation8 + $0x68] sm:$0xff]  }
 0x185   :  { %v432_v50 = vmax.f32 %v374_v42, 0.0  ;;  %1629 = vmatmul.mubr.bf16.vlgmr.msra.gmra.mrb[0].mxu0 %v534_v44 }
 0x186   :  { %v426_v52 = vmax.f32 %v366_v48, 0.0  ;;  %1513 = vmatpush3.bf16.msra.mxu0 %v1770_v41  ;;  %v1780_v48 = vld [vmem:[#allocation8 + $0x28] sm:$0xff]  }
 0x187   :  { %v2163_v57 = vpack.c.bf16 %v432_v50, %v429_v49  ;;  %1514 = vmatprep.subr.bf16.mxu0 %v1771_v47  ;;  %v1781_v50 = vld [vmem:[#allocation8 + $0x70] sm:$0xff]  }
 0x188   :  { %v2165_v59 = vpack.c.bf16 %v426_v52, %v423_v51  ;;  %v1606_v60 = vpop.f32.mrb[40].mxu1 }
 0x189   :  { %v387_v61 = vadd.f32 %v1606_v60, %v2045_v56  ;;  %v378_v2 = vpop.f32.mrb[41].mxu1  ;;  %v540_v9 = vmul.bf16 %v2163_v57, %v2163_v57  ;;  %v1783_v60 = vld [vmem:[#allocation8 + $0x78] sm:$0xff]  }
 0x18a   :  { %v379_v3 = vadd.f32 %v378_v2, %v2045_v56  ;;  %v1607_v4 = vpop.f32.mrb[42].mxu1  ;;  %1515 = vmatpush3.bf16.msra.mxu0 %v1772_v53  ;;  %v537_v5 = vmul.bf16 %v2165_v59, %v2165_v59  ;;  %v1782_v53 = vld [vmem:[#allocation8 + $0x30] sm:$0xff]   ;;  %v1786_v2 = vld [vmem:[#allocation8 + $0x88] sm:$0xff]  }
 0x18b   :  { %v390_v7 = vadd.f32 %v1607_v4, %v2045_v56  ;;  %v381_v8 = vpop.f32.mrb[43].mxu1  ;;  %1516 = vmatprep.subr.bf16.mxu0 %v1773_v58  ;;  %v441_v16 = vmax.f32 %v387_v61, 0.0  ;;  %v1785_v61 = vld [vmem:[#allocation8 + $0x80] sm:$0xff]   ;;  %v1788_v4 = vld [vmem:[#allocation8 + $0x98] sm:$0xff]  }
 0x18c   :  { %v382_v15 = vadd.f32 %v381_v8, %v2045_v56  ;;  %1632 = vmatprep.mubr.bf16.mxu0 %v537_v5  ;;  %v435_v17 = vmax.f32 %v379_v3, 0.0  ;;  %v1787_v3 = vld [vmem:[#allocation8 + $0x90] sm:$0xff]   ;;  %v1790_v5 = vld [vmem:[#allocation8 + $0xa8] sm:$0xff]  }
 0x18d   :  { %v444_v63 = vmax.f32 %v390_v7, 0.0  ;;  %1633 = vmatmul.mubr.bf16.gmra.mrb[4].mxu0 %v540_v9 }
 0x18e   :  { %v438_v20 = vmax.f32 %v382_v15, 0.0  ;;  %1517 = vmatpush3.bf16.msra.mxu0 %v1774_v6 }
 0x18f   :  { %v2175_v21 = vpack.c.bf16 %v444_v63, %v441_v16  ;;  %1518 = vmatprep.subr.bf16.mxu0 %v1775_v10 }
 0x190   :  { %v2177_v23 = vpack.c.bf16 %v438_v20, %v435_v17  ;;  %v1610_v24 = vpop.f32.mrb[44].mxu1 }
 0x191   :  { %v403_v25 = vadd.f32 %v1610_v24, %v2045_v56  ;;  %v394_v26 = vpop.f32.mrb[45].mxu1  ;;  %v546_v39 = vmul.bf16 %v2175_v21, %v2175_v21 }
 0x192   :  { %v395_v27 = vadd.f32 %v394_v26, %v2045_v56  ;;  %v1611_v28 = vpop.f32.mrb[46].mxu1  ;;  %1519 = vmatpush3.bf16.msra.mxu0 %v1776_v0  ;;  %v543_v32 = vmul.bf16 %v2177_v23, %v2177_v23 }
 0x193   :  { %v406_v35 = vadd.f32 %v1611_v28, %v2045_v56  ;;  %v397_v38 = vpop.f32.mrb[47].mxu1  ;;  %1520 = vmatprep.subr.bf16.mxu0 %v1777_v22  ;;  %v453_v42 = vmax.f32 %v403_v25, 0.0 }
 0x194   :  { %v398_v41 = vadd.f32 %v397_v38, %v2045_v56  ;;  %1636 = vmatprep.mubr.bf16.mxu0 %v543_v32  ;;  %v447_v44 = vmax.f32 %v395_v27, 0.0  ;;  %v1784_v56 = vld [vmem:[#allocation8 + $0x38] sm:$0xff]  }
 0x195   :  { %v456_v43 = vmax.f32 %v406_v35, 0.0  ;;  %1637 = vmatmul.mubr.bf16.gmra.mrb[8].mxu0 %v546_v39 }
 0x196   :  { %v450_v47 = vmax.f32 %v398_v41, 0.0  ;;  %1521 = vmatpush3.bf16.msra.mxu0 %v1778_v34 }
 0x197   :  { %v480_v49 = vpack.c.bf16 %v456_v43, %v453_v42  ;;  %1522 = vmatprep.subr.bf16.mxu0 %v1779_v40 }
 0x198   :  { %v477_v51 = vpack.c.bf16 %v450_v47, %v447_v44 }
 0x199   :  { %v552_v58 = vmul.bf16 %v480_v49, %v480_v49 }
 0x19a   :  { %1523 = vmatpush3.bf16.msra.mxu0 %v1780_v48  ;;  %v549_v52 = vmul.bf16 %v477_v51, %v477_v51 }
 0x19b   :  { %1524 = vmatprep.subr.bf16.mxu0 %v1781_v50 }
 0x19c   :  { %1640 = vmatprep.mubr.bf16.mxu0 %v549_v52 }
 0x19d   :  { %1641 = vmatmul.mubr.bf16.gmra.mrb[12].mxu0 %v552_v58 }
 0x19e   :  { %1525 = vmatpush3.bf16.msra.mxu0 %v1782_v53  ;;  %1115 = vmatprep.mubr.bf16.mxu0 %v2057_v14  ;;  %v1789_v14 = vld [vmem:[#allocation8 + $0xa0] sm:$0xff]  }
 0x19f   :  { %1526 = vmatprep.subr.bf16.mxu0 %v1783_v60 }
 0x1a2   :  { %1527 = vmatpush3.bf16.msra.mxu0 %v1784_v56 }
 0x1a3   :  { %1644 = vmatprep.subr.bf16.mxu0 %v1785_v61 }
 0x1a5   :  { %1116 = vmatmul.mubr.bf16.vlgmr.msra.gmra.mrb[16].mxu0 %v2055_v13  ;;  %v1791_v13 = vld [vmem:[#allocation8 + $0xb0] sm:$0xff]  }
 0x1a6   :  { %1123 = vmatprep.mubr.bf16.mxu0 %v2069_v30  ;;  %1645 = vmatpush3.bf16.msra.mxu0 %v1785_v61  ;;  %v1792_v30 = vld [vmem:[#allocation8 + $0xb8] sm:$0xff]  }
 0x1a7   :  { %1646 = vmatprep.subr.bf16.mxu0 %v1786_v2 }
 0x1aa   :  { %1647 = vmatpush3.bf16.msra.mxu0 %v1786_v2 }
 0x1ab   :  { %1648 = vmatprep.subr.bf16.mxu0 %v1787_v3 }
 0x1ad   :  { %1124 = vmatmul.mubr.bf16.gmra.mrb[20].mxu0 %v2067_v29 }
 0x1ae   :  { %1131 = vmatprep.mubr.bf16.mxu0 %v2081_v46  ;;  %1649 = vmatpush3.bf16.msra.mxu0 %v1787_v3 }
 0x1af   :  { %1650 = vmatprep.subr.bf16.mxu0 %v1788_v4 }
 0x1b2   :  { %1651 = vmatpush3.bf16.msra.mxu0 %v1788_v4 }
 0x1b3   :  { %1652 = vmatprep.subr.bf16.mxu0 %v1789_v14 }
 0x1b5   :  { %1132 = vmatmul.mubr.bf16.gmra.mrb[24].mxu0 %v2079_v45 }
 0x1b6   :  { %1139 = vmatprep.mubr.bf16.mxu0 %v2093_v1  ;;  %1653 = vmatpush3.bf16.msra.mxu0 %v1789_v14 }
 0x1b7   :  { %1654 = vmatprep.subr.bf16.mxu0 %v1790_v5 }
 0x1ba   :  { %1655 = vmatpush3.bf16.msra.mxu0 %v1790_v5 }
 0x1bb   :  { %1656 = vmatprep.subr.bf16.mxu0 %v1791_v13 }
 0x1bd   :  { %1140 = vmatmul.mubr.bf16.gmra.mrb[28].mxu0 %v2091_v62 }
 0x1be   :  { %1147 = vmatprep.mubr.bf16.mxu0 %v2105_v19  ;;  %1657 = vmatpush3.bf16.msra.mxu0 %v1791_v13 }
 0x1bf   :  { %1658 = vmatprep.subr.bf16.mxu0 %v1792_v30 }
 0x1c2   :  { %1659 = vmatpush3.bf16.msra.mxu0 %v1792_v30 }
 0x1c5   :  { %1148 = vmatmul.mubr.bf16.gmra.mrb[32].mxu0 %v2103_v18 }
 0x1c6   :  { %1155 = vmatprep.mubr.bf16.mxu0 %v2117_v37 }
 0x1cd   :  { %1156 = vmatmul.mubr.bf16.gmra.mrb[36].mxu0 %v2115_v36 }
 0x1ce   :  { %1163 = vmatprep.mubr.bf16.mxu0 %v2129_v55 }
 0x1d5   :  { %1164 = vmatmul.mubr.bf16.gmra.mrb[40].mxu0 %v2127_v54 }
 0x1d6   :  { %1171 = vmatprep.mubr.bf16.mxu0 %v2141_v12 }
 0x1dd   :  { %1172 = vmatmul.mubr.bf16.gmra.mrb[44].mxu0 %v2139_v11 }
 0x1de   :  { %1660 = vmatprep.mubr.bf16.mxu0 %v2153_v33 }
 0x1e5   :  { %1661 = vmatmul.mubr.bf16.vlgmr.msra.gmra.mrb[0].mxu0 %v2151_v31 }
 0x1e6   :  { %1664 = vmatprep.mubr.bf16.mxu0 %v2165_v59 }
 0x1ed   :  { %1665 = vmatmul.mubr.bf16.gmra.mrb[4].mxu0 %v2163_v57 }
 0x1ee   :  { %1668 = vmatprep.mubr.bf16.mxu0 %v2177_v23 }
 0x1f5   :  { %1669 = vmatmul.mubr.bf16.gmra.mrb[8].mxu0 %v2175_v21 }
 0x1f6   :  { %1672 = vmatprep.mubr.bf16.mxu0 %v477_v51 }
 0x1fd   :  { %1673 = vmatmul.mubr.bf16.gmra.mrb[12].mxu0 %v480_v49 }
 0x218   :  { %v1448_v29 = vpop.f32.mrb[48].mxu1 }
 0x219   :  { %v1449_v45 = vpop.f32.mrb[49].mxu1 }
 0x21a   :  { %v1450_v46 = vadd.f32 %v1449_v45, %v1448_v29  ;;  %v1451_v62 = vpop.f32.mrb[50].mxu1 }
 0x21b   :  { %v1452_v1 = vpop.f32.mrb[51].mxu1 }
 0x21c   :  { %v1453_v18 = vadd.f32 %v1452_v1, %v1451_v62 }
 0x220   :  { %v1454_v19 = vpop.f32.mrb[52].mxu1 }
 0x221   :  { %v1455_v36 = vpop.f32.mrb[53].mxu1 }
 0x222   :  { %v1456_v37 = vadd.f32 %v1455_v36, %v1454_v19  ;;  %v1457_v54 = vpop.f32.mrb[54].mxu1 }
 0x223   :  { %v1458_v55 = vpop.f32.mrb[55].mxu1 }
 0x224   :  { %v1459_v11 = vadd.f32 %v1458_v55, %v1457_v54 }
 0x228   :  { %v1460_v12 = vpop.f32.mrb[56].mxu1 }
 0x229   :  { %v1461_v31 = vpop.f32.mrb[57].mxu1 }
 0x22a   :  { %v1462_v33 = vadd.f32 %v1461_v31, %v1460_v12  ;;  %v1463_v57 = vpop.f32.mrb[58].mxu1 }
 0x22b   :  { %v1464_v59 = vpop.f32.mrb[59].mxu1 }
 0x22c   :  { %v1465_v6 = vadd.f32 %v1464_v59, %v1463_v57 }
 0x230   :  { %v1466_v7 = vpop.f32.mrb[60].mxu1 }
 0x231   :  { %v1467_v8 = vpop.f32.mrb[61].mxu1 }
 0x232   :  { %v1468_v9 = vadd.f32 %v1467_v8, %v1466_v7  ;;  %v1469_v10 = vpop.f32.mrb[62].mxu1 }
 0x233   :  { %v1470_v15 = vpop.f32.mrb[63].mxu1 }
 0x234   :  { %v1471_v16 = vadd.f32 %v1470_v15, %v1469_v10 }
 0x238   :  { %v1472_v63 = vpop.f32.mrb[64].mxu1 }
 0x239   :  { %v1473_v17 = vpop.f32.mrb[65].mxu1 }
 0x23a   :  { %v1474_v20 = vadd.f32 %v1473_v17, %v1472_v63  ;;  %v1475_v0 = vpop.f32.mrb[66].mxu1 }
 0x23b   :  { %v1476_v21 = vpop.f32.mrb[67].mxu1 }
 0x23c   :  { %v1477_v22 = vadd.f32 %v1476_v21, %v1475_v0 }
 0x240   :  { %v1478_v23 = vpop.f32.mrb[68].mxu1 }
 0x241   :  { %v1479_v24 = vpop.f32.mrb[69].mxu1 }
 0x242   :  { %v1480_v25 = vadd.f32 %v1479_v24, %v1478_v23  ;;  %v1481_v26 = vpop.f32.mrb[70].mxu1 }
 0x243   :  { %v1482_v27 = vpop.f32.mrb[71].mxu1 }
 0x244   :  { %v1483_v28 = vadd.f32 %v1482_v27, %v1481_v26 }
 0x248   :  { %v1484_v32 = vpop.f32.mrb[72].mxu1 }
 0x249   :  { %v1485_v34 = vpop.f32.mrb[73].mxu1 }
 0x24a   :  { %v2209_v35 = vadd.f32 %v1485_v34, %v1484_v32  ;;  %v1487_v38 = vpop.f32.mrb[74].mxu1 }
 0x24b   :  { %v1488_v39 = vpop.f32.mrb[75].mxu1 }
 0x24c   :  { %v1489_v40 = vadd.f32 %v1488_v39, %v1487_v38 }
 0x250   :  { %v1490_v41 = vpop.f32.mrb[76].mxu1 }
 0x251   :  { %v1491_v42 = vpop.f32.mrb[77].mxu1 }
 0x252   :  { %v2211_v43 = vadd.f32 %v1491_v42, %v1490_v41  ;;  %v1493_v44 = vpop.f32.mrb[78].mxu1 }
 0x253   :  { %v1494_v47 = vpop.f32.mrb[79].mxu1 }
 0x254   :  { %v2213_v48 = vadd.f32 %v1494_v47, %v1493_v44 }
 0x278   :  { %v1528_v49 = vpop.f32.mrb[16].mxu0 }
 0x279   :  { %v1529_v50 = vpop.f32.mrb[17].mxu0 }
 0x27a   :  { %v1530_v51 = vadd.f32 %v1529_v50, %v1528_v49  ;;  %v1531_v52 = vpop.f32.mrb[18].mxu0 }
 0x27b   :  { %v1532_v53 = vpop.f32.mrb[19].mxu0 }
 0x27c   :  { %v1533_v58 = vadd.f32 %v1532_v53, %v1531_v52  ;;  %v1678_v60 = vadd.f32 %v1530_v51, %v1450_v46 }
 0x27e   :  { %v2215_v56 = vadd.f32 %v1533_v58, %v1453_v18 }
 0x280   :  { %v1534_v61 = vpop.f32.mrb[20].mxu0 }
 0x281   :  { %v1535_v2 = vpop.f32.mrb[21].mxu0 }
 0x282   :  { %v1536_v3 = vadd.f32 %v1535_v2, %v1534_v61  ;;  %v1537_v4 = vpop.f32.mrb[22].mxu0 }
 0x283   :  { %v1538_v14 = vpop.f32.mrb[23].mxu0 }
 0x284   :  { %v1539_v5 = vadd.f32 %v1538_v14, %v1537_v4  ;;  %v1676_v13 = vadd.f32 %v1536_v3, %v1456_v37 }
 0x286   :  { %v1680_v30 = vadd.f32 %v1539_v5, %v1459_v11 }
 0x288   :  { %v1540_v29 = vpop.f32.mrb[24].mxu0 }
 0x289   :  { %v1541_v45 = vpop.f32.mrb[25].mxu0 }
 0x28a   :  { %v1542_v62 = vadd.f32 %v1541_v45, %v1540_v29  ;;  %v1543_v1 = vpop.f32.mrb[26].mxu0 }
 0x28b   :  { %v1544_v19 = vpop.f32.mrb[27].mxu0 }
 0x28c   :  { %v1545_v36 = vadd.f32 %v1544_v19, %v1543_v1  ;;  %v1686_v54 = vadd.f32 %v1542_v62, %v1462_v33 }
 0x28e   :  { %v1690_v55 = vadd.f32 %v1545_v36, %v1465_v6 }
 0x290   :  { %v1546_v12 = vpop.f32.mrb[28].mxu0 }
 0x291   :  { %v1547_v46 = vpop.f32.mrb[29].mxu0 }
 0x292   :  { %v1548_v18 = vadd.f32 %v1547_v46, %v1546_v12  ;;  %v1549_v31 = vpop.f32.mrb[30].mxu0 }
 0x293   :  { %v1550_v57 = vpop.f32.mrb[31].mxu0 }
 0x294   :  { %v1551_v59 = vadd.f32 %v1550_v57, %v1549_v31  ;;  %v1684_v7 = vadd.f32 %v1548_v18, %v1468_v9 }
 0x296   :  { %v1688_v8 = vadd.f32 %v1551_v59, %v1471_v16 }
 0x298   :  { %v1552_v10 = vpop.f32.mrb[32].mxu0 }
 0x299   :  { %v1553_v15 = vpop.f32.mrb[33].mxu0 }
 0x29a   :  { %v1554_v37 = vadd.f32 %v1553_v15, %v1552_v10  ;;  %v1555_v11 = vpop.f32.mrb[34].mxu0 }
 0x29b   :  { %v1556_v63 = vpop.f32.mrb[35].mxu0 }
 0x29c   :  { %v1557_v17 = vadd.f32 %v1556_v63, %v1555_v11  ;;  %v1694_v0 = vadd.f32 %v1554_v37, %v1474_v20 }
 0x29e   :  { %v1698_v21 = vadd.f32 %v1557_v17, %v1477_v22 }
 0x2a0   :  { %v1558_v23 = vpop.f32.mrb[36].mxu0 }
 0x2a1   :  { %v1559_v24 = vpop.f32.mrb[37].mxu0 }
 0x2a2   :  { %v1560_v33 = vadd.f32 %v1559_v24, %v1558_v23  ;;  %v1561_v6 = vpop.f32.mrb[38].mxu0 }
 0x2a3   :  { %v1562_v26 = vpop.f32.mrb[39].mxu0 }
 0x2a4   :  { %v1563_v27 = vadd.f32 %v1562_v26, %v1561_v6  ;;  %v1692_v32 = vadd.f32 %v1560_v33, %v1480_v25 }
 0x2a6   :  { %v1696_v34 = vadd.f32 %v1563_v27, %v1483_v28  ;;  %v1330_v27 = vstv %s1318_s29 }
 0x2a8   :  { %v1564_v38 = vpop.f32.mrb[40].mxu0 }
 0x2a9   :  { %v1565_v39 = vpop.f32.mrb[41].mxu0 }
 0x2aa   :  { %v1566_v9 = vadd.f32 %v1565_v39, %v1564_v38  ;;  %v1567_v16 = vpop.f32.mrb[42].mxu0 }
 0x2ab   :  { %v1568_v41 = vpop.f32.mrb[43].mxu0 }
 0x2ac   :  { %v1569_v42 = vadd.f32 %v1568_v41, %v1567_v16  ;;  %v1702_v44 = vadd.f32 %v1566_v9, %v2209_v35 }
 0x2ae   :  { %v1706_v47 = vadd.f32 %v1569_v42, %v1489_v40 }
 0x2b0   :  { %v1570_v49 = vpop.f32.mrb[44].mxu0 }
 0x2b1   :  { %v1571_v20 = vpop.f32.mrb[45].mxu0 }
 0x2b2   :  { %v1572_v22 = vadd.f32 %v1571_v20, %v1570_v49  ;;  %v1573_v50 = vpop.f32.mrb[46].mxu0 }
 0x2b3   :  { %v1574_v51 = vpop.f32.mrb[47].mxu0 }
 0x2b4   :  { %v1575_v52 = vadd.f32 %v1574_v51, %v1573_v50  ;;  %v1700_v53 = vadd.f32 %v1572_v22, %v2211_v43 }
 0x2b6   :  { %v1704_v25 = vadd.f32 %v1575_v52, %v2213_v48 }
 0x2b8   :  { %v1662_v28 = vpop.f32.mrb[0].mxu0 }
 0x2b9   :  { %v1677_v58 = vadd.f32 %v1676_v13, %v1662_v28  ;;  %v1214_v61 = vpop.f32.mrb[1].mxu0 }
 0x2ba   :  { %v1663_v2 = vpop.f32.mrb[2].mxu0  ;;  %v1679_v3 = vadd.f32 %v1678_v60, %v1214_v61 }
 0x2bb   :  { %v1681_v4 = vadd.f32 %v1680_v30, %v1663_v2  ;;  %v1217_v14 = vpop.f32.mrb[3].mxu0 }
 0x2bc   :  { %v1683_v35 = vadd.f32 %v2215_v56, %v1217_v14  ;;  %1277 = vxpose.xlu0.b32.start [1/16] (narrow) %v1679_v3, 8 }
 0x2c0   :  { %v1666_v40 = vpop.f32.mrb[4].mxu0  ;;  %1278 = vxpose.xlu0.b32.cont [2/16] (narrow) %v1683_v35, 8 }
 0x2c1   :  { %v1685_v5 = vadd.f32 %v1684_v7, %v1666_v40  ;;  %v1230_v29 = vpop.f32.mrb[5].mxu0 }
 0x2c2   :  { %v1687_v45 = vadd.f32 %v1686_v54, %v1230_v29  ;;  %v1667_v62 = vpop.f32.mrb[6].mxu0 }
 0x2c3   :  { %v1689_v1 = vadd.f32 %v1688_v8, %v1667_v62  ;;  %v1233_v43 = vpop.f32.mrb[7].mxu0 }
 0x2c4   :  { %v1691_v19 = vadd.f32 %v1690_v55, %v1233_v43  ;;  %1279 = vxpose.xlu0.b32.cont [3/16] (narrow) %v1677_v58, 8 }
 0x2c8   :  { %v1670_v48 = vpop.f32.mrb[8].mxu0  ;;  %1280 = vxpose.xlu0.b32.cont [4/16] (narrow) %v1681_v4, 8 }
 0x2c9   :  { %v1693_v13 = vadd.f32 %v1692_v32, %v1670_v48  ;;  %v1246_v36 = vpop.f32.mrb[9].mxu0 }
 0x2ca   :  { %v1695_v60 = vadd.f32 %v1694_v0, %v1246_v36  ;;  %v1671_v30 = vpop.f32.mrb[10].mxu0 }
 0x2cb   :  { %v1697_v12 = vadd.f32 %v1696_v34, %v1671_v30  ;;  %v1249_v46 = vpop.f32.mrb[11].mxu0 }
 0x2cc   :  { %v1699_v56 = vadd.f32 %v1698_v21, %v1249_v46  ;;  %1281 = vxpose.xlu0.b32.cont [5/16] (narrow) %v1687_v45, 8  ;;  %v1320_v21 = vstv %s1421_s2 }
 0x2d0   :  { %v1674_v18 = vpop.f32.mrb[12].mxu0  ;;  %1282 = vxpose.xlu0.b32.cont [6/16] (narrow) %v1691_v19, 8 }
 0x2d1   :  { %v1701_v31 = vadd.f32 %v1700_v53, %v1674_v18  ;;  %v1262_v57 = vpop.f32.mrb[13].mxu0 }
 0x2d2   :  { %v1703_v54 = vadd.f32 %v1702_v44, %v1262_v57  ;;  %v1675_v59 = vpop.f32.mrb[14].mxu0 }
 0x2d3   :  { %v1705_v7 = vadd.f32 %v1704_v25, %v1675_v59  ;;  %v1265_v8 = vpop.f32.mrb[15].mxu0 }
 0x2d4   :  { %v1707_v55 = vadd.f32 %v1706_v47, %v1265_v8  ;;  %1283 = vxpose.xlu0.b32.cont [7/16] (narrow) %v1685_v5, 8 }
 0x2d8   :  { %1284 = vxpose.xlu0.b32.cont [8/16] (narrow) %v1689_v1, 8 }
 0x2dc   :  { %1285 = vxpose.xlu0.b32.cont [9/16] (narrow) %v1695_v60, 8 }
 0x2e0   :  { %1286 = vxpose.xlu0.b32.cont [10/16] (narrow) %v1699_v56, 8 }
 0x2e4   :  { %1287 = vxpose.xlu0.b32.cont [11/16] (narrow) %v1693_v13, 8 }
 0x2e8   :  { %1288 = vxpose.xlu0.b32.cont [12/16] (narrow) %v1697_v12, 8 }
 0x2ec   :  { %1289 = vxpose.xlu0.b32.cont [13/16] (narrow) %v1703_v54, 8 }
 0x2f0   :  { %1290 = vxpose.xlu0.b32.cont [14/16] (narrow) %v1707_v55, 8 }
 0x2f4   :  { %1291 = vxpose.xlu0.b32.cont [15/16] (narrow) %v1701_v31, 8 }
 0x2f8   :  { %1292 = vxpose.xlu0.b32.end [16/16] (narrow) %v1705_v7, 8 }
 0x33c   :  { %v1293_v10 = vpop.trf.xlu0 }
 0x33d   :  { %v1309_v15 = vmul.f32 0.0033333334, %v1293_v10 }
 0x33f   :  { %v1310_v37 = vmul.f32 %v1309_v15, %v1309_v15  ;;  %v1321_v23 = vmul.f32 %v1320_v21, %v1309_v15 }
 0x341   :  { %v1312_v11 = vrot.slane %v1310_v37, 6  ;;  %v1323_v24 = vrot.slane %v1321_v23, 7 }
 0x343   :  { %v1314_v63 = vsub.f32 %v1309_v15, %v1312_v11  ;;  %v1325_v6 = vsub.f32 %v1293_v10, %v1323_v24 }
 0x345   :  { %v1315_v17 = vmax.f32 %v1314_v63, 0.0 }
 0x347   :  { %v1316_v0 = vadd.f32 1e-05, %v1315_v17 }
 0x349   :  { %1793 = vrsqrt.f32 %v1316_v0 }
 0x353   :  { %v1794_v33 = vpop.eup %1793 }
 0x354   :  { %v1327_v26 = vrot.slane %v1794_v33, 1 }
 0x356   :  { %v1329_v32 = vmul.f32 %v1327_v26, %v1325_v6 }
 0x358   :  { %v1331_v34 = vadd.f32 %v1330_v27, %v1329_v32 }
 0x35a   :  { %1332 = vst [vmem:[#allocation12 - $0x1] sm:$0x2] %v1331_v34 }
 0x35b   :  { %1906 = shalt.err (!%p1903_p13)
}
 0x35c   :  { %s1907_s11 = scalar_lea.hbm %s2239_s6, 16 }
 0x35d   :  { %p1908_p0 = scmp.ne.s32.totalorder %s2239_s6, %s1907_s11  ;;  %p1911_p1 = scmp.lt.u32.totalorder %s1907_s11, %s2239_s6 }
 0x35f   :  { %p1913_p2 = pnand %p1911_p1, %p1908_p0 }
 0x361   :  { %1916 = shalt.err (!%p1913_p2)
}
 0x362   :  { %1342 = dma.vmem_to_hbm [thread:$0]  %s1340_s7, 16, %s2239_s6, [#allocation4]  }
 0x363   :  { %1925 = dma.done.wait [#allocation4], 16  }
 0x364   :  { %1926 = vsyncadd [#allocation4], 4294967280 }
 0x365   :  { %1346 = vsyncpa [#allocation3], 1 }
 0x366   :  { %1347 = vsyncpa [#allocation7], 1 }
 0x367   :  { %1348 = vsyncpa [#allocation10], 1 }
 0x368   :  { %1349 = vsyncpa [#allocation4], 1 }
 0x369   :  { %1350 = vsyncpa [#allocation5], 1 }

</bundles_post_ra>
